<compile_context>
chip_gen: v7x
topology: tpu7x:2x2x1
jax: 0.10.0
libtpu: 0.0.40
codegen_flags: <defaults>
</compile_context>

<pallas_src>
import jax
import jax.numpy as jnp
from jax.experimental import pallas as pl
from jax.experimental.pallas import tpu as pltpu


def _round_up(x, m):
    return ((x + m - 1) // m) * m


def critic_kernel(s_ref, a_ref, w1s_ref, w1a_ref, b1_ref,
                  w2_ref, b2_ref, w3r_ref, b3_ref, o_ref):
    # Layer 1: fused concat -> split matmul (state @ W1_s + action @ W1_a).
    h1 = (jnp.dot(s_ref[...], w1s_ref[...], preferred_element_type=jnp.float32)
          + jnp.dot(a_ref[...], w1a_ref[...], preferred_element_type=jnp.float32)
          + b1_ref[...])
    h1 = jnp.maximum(h1, 0.0)

    # Layer 2: MXU matmul (operands in compute dtype, f32 accumulation).
    h2 = (jnp.dot(h1.astype(w2_ref.dtype), w2_ref[...],
                  preferred_element_type=jnp.float32)
          + b2_ref[...])
    h2 = jnp.maximum(h2, 0.0)

    # Layer 3 (H2 -> 1): VPU multiply + XLU lane reduction, keeps the MXU free
    # instead of burning a full MXU pass to produce a single output column.
    q = jnp.sum(h2 * w3r_ref[...], axis=-1, keepdims=True) + b3_ref[...]
    o_ref[...] = q.astype(o_ref.dtype)


def init_critic_params(key, state_dim, action_dim, hidden_sizes=(128, 128)):
    """Deterministic synthetic parameters (PyTorch-like uniform fan-in init).

    Weights stored as [in_features, out_features] (transpose of torch layout).
    """
    in_dim = state_dim + action_dim
    dims = [in_dim, hidden_sizes[0], hidden_sizes[1], 1]
    params = []
    for i in range(3):
        key, kw, kb = jax.random.split(key, 3)
        bound = 1.0 / jnp.sqrt(dims[i])
        w = jax.random.uniform(kw, (dims[i], dims[i + 1]), jnp.float32, -bound, bound)
        b = jax.random.uniform(kb, (1, dims[i + 1]), jnp.float32, -bound, bound)
        params += [w, b]
    return tuple(params)


def critic_reference(state, action, params, compute_dtype=jnp.float32):
    """Plain-XLA forward.  Mirrors the kernel's cast points exactly, so it
    doubles as (a) the correctness reference and (b) the tiny-batch fast path."""
    w1, b1, w2, b2, w3, b3 = params
    sd = state.shape[-1]
    s = state.astype(compute_dtype)
    a = action.astype(compute_dtype)
    w1s = w1[:sd].astype(compute_dtype)
    w1a = w1[sd:].astype(compute_dtype)
    h1 = (jnp.dot(s, w1s, preferred_element_type=jnp.float32)
          + jnp.dot(a, w1a, preferred_element_type=jnp.float32) + b1)
    h1 = jnp.maximum(h1, 0.0)
    h2 = jnp.dot(h1.astype(compute_dtype), w2.astype(compute_dtype),
                 preferred_element_type=jnp.float32) + b2
    h2 = jnp.maximum(h2, 0.0)
    return jnp.sum(h2 * w3.reshape(1, -1), axis=-1, keepdims=True) + b3


def critic_forward(state, action, params, *,
                   block_rows=4096,
                   compute_dtype=jnp.float32,
                   use_pallas=None,
                   interpret=False):
    """Matches Critic.forward: handles 2D or 3D inputs, returns (..., 1) f32."""
    w1, b1, w2, b2, w3, b3 = params
    state_dim = state.shape[-1]
    action_dim = action.shape[-1]
    h1_dim = w1.shape[1]
    h2_dim = w2.shape[1]

    lead_shape = state.shape[:-1]
    s2 = state.reshape(-1, state_dim).astype(compute_dtype)
    a2 = action.reshape(-1, action_dim).astype(compute_dtype)
    batch = s2.shape[0]

    # Tiny batches: launch overhead dominates a 3-matmul MLP -> plain XLA path.
    if use_pallas is None:
        use_pallas = batch >= 1024
    if not use_pallas:
        out = critic_reference(state, action, params, compute_dtype=compute_dtype)
        return out.astype(jnp.float32)

    # Fuse the concat into the kernel by splitting W1 into state/action halves.
    w1s = w1[:state_dim].astype(compute_dtype)
    w1a = w1[state_dim:].astype(compute_dtype)
    w2c = w2.astype(compute_dtype)
    w3_row = w3.reshape(1, h2_dim).astype(jnp.float32)   # [1, H2] for VPU reduce
    b1f = b1.astype(jnp.float32)
    b2f = b2.astype(jnp.float32)
    b3f = b3.reshape(1, 1).astype(jnp.float32)

    # Batch tiling: TM rows per grid step (multiple of 8 f32 sublanes).
    # block_rows=4096 keeps double-buffered inputs + f32 intermediates well
    # under the 32 MiB scoped-VMEM default (and v7x's 64 MiB physical VMEM).
    tm = _round_up(min(int(block_rows), _round_up(batch, 8)), 8)
    padded = _round_up(batch, tm)
    if padded != batch:
        s2 = jnp.pad(s2, ((0, padded - batch), (0, 0)))
        a2 = jnp.pad(a2, ((0, padded - batch), (0, 0)))
    grid = (padded // tm,)

    itemsize = jnp.dtype(compute_dtype).itemsize
    cost = pl.CostEstimate(
        flops=2 * padded * ((state_dim + action_dim) * h1_dim + h1_dim * h2_dim + h2_dim),
        transcendentals=0,
        bytes_accessed=(padded * (state_dim + action_dim) * itemsize   # inputs
                        + padded * 4                                   # f32 output
                        + ((state_dim + action_dim) * h1_dim + h1_dim * h2_dim) * itemsize
                        + (h1_dim + 2 * h2_dim + 1) * 4),              # biases + w3
    )

    out = pl.pallas_call(
        critic_kernel,
        out_shape=jax.ShapeDtypeStruct((padded, 1), jnp.float32),
        grid=grid,
        in_specs=[
            pl.BlockSpec((tm, state_dim), lambda i: (i, 0)),      # state tile
            pl.BlockSpec((tm, action_dim), lambda i: (i, 0)),     # action tile
            # weights/biases: constant block index -> stay resident in VMEM
            pl.BlockSpec((state_dim, h1_dim), lambda i: (0, 0)),
            pl.BlockSpec((action_dim, h1_dim), lambda i: (0, 0)),
            pl.BlockSpec((1, h1_dim), lambda i: (0, 0)),
            pl.BlockSpec((h1_dim, h2_dim), lambda i: (0, 0)),
            pl.BlockSpec((1, h2_dim), lambda i: (0, 0)),
            pl.BlockSpec((1, h2_dim), lambda i: (0, 0)),
            pl.BlockSpec((1, 1), lambda i: (0, 0)),
        ],
        out_specs=pl.BlockSpec((tm, 1), lambda i: (i, 0)),
        compiler_params=pltpu.CompilerParams(
            # batch tiles are independent -> shard across v7x's 2 TensorCores
            dimension_semantics=("parallel",),
        ),
        cost_estimate=cost,
        interpret=interpret,
    )(s2, a2, w1s, w1a, b1f, w2c, b2f, w3_row, b3f)

    out = out[:batch]
    return out.reshape(*lead_shape, 1)


if __name__ == "__main__":
    key = jax.random.PRNGKey(0)
    batch, state_dim, action_dim = 8, 16, 8
    hidden_sizes = (128, 128)

    k_params, k_s, k_a, k_s3, k_a3 = jax.random.split(key, 5)
    params = init_critic_params(k_params, state_dim, action_dim, hidden_sizes)

    state = jax.random.normal(k_s, (batch, state_dim), jnp.float32)
    action = jax.random.normal(k_a, (batch, action_dim), jnp.float32)

    # 2D path, f32 compute.  Force the Pallas kernel even at this demo batch
    # (the auto-dispatch would otherwise take the tiny-batch XLA fast path).
    q = critic_forward(state, action, params, use_pallas=True)
    q = jax.block_until_ready(q)
    q_ref = critic_reference(state, action, params)
    assert q.shape == (batch, 1), q.shape
    assert jnp.allclose(q, q_ref, atol=1e-4, rtol=1e-4), (q, q_ref)

    # 3D path (leading-dim flatten + row padding), bf16 matmul operands
    # (the v6e/v7x bandwidth option), f32 accumulation.
    state3 = jax.random.normal(k_s3, (2, 5, state_dim), jnp.float32)
    action3 = jax.random.normal(k_a3, (2, 5, action_dim), jnp.float32)
    q3 = critic_forward(state3, action3, params,
                        compute_dtype=jnp.bfloat16, use_pallas=True)
    q3 = jax.block_until_ready(q3)
    q3_ref = critic_reference(state3, action3, params, compute_dtype=jnp.bfloat16)
    assert q3.shape == (2, 5, 1), q3.shape
    assert jnp.allclose(q3, q3_ref, atol=5e-2, rtol=5e-2), (q3, q3_ref)

    print("KERNEL_OK")
</pallas_src>

<mosaic_0001>
module attributes {stable_mosaic.version = 11 : i64} {
  func.func @critic_kernel(%arg0: i32, %arg1: memref<8x16xf32, #tpu.memory_space<vmem>>, %arg2: memref<8x8xf32, #tpu.memory_space<vmem>>, %arg3: memref<16x128xf32, #tpu.memory_space<vmem>>, %arg4: memref<8x128xf32, #tpu.memory_space<vmem>>, %arg5: memref<1x128xf32, #tpu.memory_space<vmem>>, %arg6: memref<128x128xf32, #tpu.memory_space<vmem>>, %arg7: memref<1x128xf32, #tpu.memory_space<vmem>>, %arg8: memref<1x128xf32, #tpu.memory_space<vmem>>, %arg9: memref<1x1xf32, #tpu.memory_space<vmem>>, %arg10: memref<8x1xf32, #tpu.memory_space<vmem>>) attributes {dimension_semantics = [#tpu.dimension_semantics<parallel>], iteration_bounds = array<i64: 1>, scalar_prefetch = 0 : i64, scratch_operands = 0 : i64, tpu.core_type = #tpu.core_type<tc>, window_params = [{transform_indices = @transform_0, window_bounds = array<i64: 8, 16>}, {transform_indices = @transform_1, window_bounds = array<i64: 8, 8>}, {pipeline_mode = #tpu.pipeline_mode<synchronous>, transform_indices = @transform_2, window_bounds = array<i64: 16, 128>}, {pipeline_mode = #tpu.pipeline_mode<synchronous>, transform_indices = @transform_3, window_bounds = array<i64: 8, 128>}, {pipeline_mode = #tpu.pipeline_mode<synchronous>, transform_indices = @transform_4, window_bounds = array<i64: 1, 128>}, {pipeline_mode = #tpu.pipeline_mode<synchronous>, transform_indices = @transform_5, window_bounds = array<i64: 128, 128>}, {pipeline_mode = #tpu.pipeline_mode<synchronous>, transform_indices = @transform_6, window_bounds = array<i64: 1, 128>}, {pipeline_mode = #tpu.pipeline_mode<synchronous>, transform_indices = @transform_7, window_bounds = array<i64: 1, 128>}, {pipeline_mode = #tpu.pipeline_mode<synchronous>, transform_indices = @transform_8, window_bounds = array<i64: 1, 1>}, {transform_indices = @transform_9, window_bounds = array<i64: 8, 1>}]} {
    %c0 = arith.constant 0 : index
    %c0_0 = arith.constant 0 : index
    %0 = vector.load %arg1[%c0, %c0_0] : memref<8x16xf32, #tpu.memory_space<vmem>>, vector<8x16xf32>
    %c0_1 = arith.constant 0 : index
    %c0_2 = arith.constant 0 : index
    %1 = vector.load %arg3[%c0_1, %c0_2] : memref<16x128xf32, #tpu.memory_space<vmem>>, vector<16x128xf32>
    %cst = arith.constant dense<0.000000e+00> : vector<8x128xf32>
    %2 = tpu.matmul %0, %1, %cst {dimension_numbers = #tpu.dot_dimension_numbers<[1], [0], [0], [1], [0, 0, 1, 1], [], []>} : vector<8x16xf32>, vector<16x128xf32>, vector<8x128xf32> -> vector<8x128xf32>
    %c0_3 = arith.constant 0 : index
    %c0_4 = arith.constant 0 : index
    %3 = vector.load %arg2[%c0_3, %c0_4] : memref<8x8xf32, #tpu.memory_space<vmem>>, vector<8x8xf32>
    %c0_5 = arith.constant 0 : index
    %c0_6 = arith.constant 0 : index
    %4 = vector.load %arg4[%c0_5, %c0_6] : memref<8x128xf32, #tpu.memory_space<vmem>>, vector<8x128xf32>
    %cst_7 = arith.constant dense<0.000000e+00> : vector<8x128xf32>
    %5 = tpu.matmul %3, %4, %cst_7 {dimension_numbers = #tpu.dot_dimension_numbers<[1], [0], [0], [1], [0, 0, 1, 1], [], []>} : vector<8x8xf32>, vector<8x128xf32>, vector<8x128xf32> -> vector<8x128xf32>
    %6 = arith.addf %2, %5 : vector<8x128xf32>
    %c0_8 = arith.constant 0 : index
    %c0_9 = arith.constant 0 : index
    %7 = vector.load %arg5[%c0_8, %c0_9] : memref<1x128xf32, #tpu.memory_space<vmem>>, vector<1x128xf32>
    %8 = vector.broadcast %7 : vector<1x128xf32> to vector<8x128xf32>
    %9 = arith.addf %6, %8 : vector<8x128xf32>
    %cst_10 = arith.constant 0.000000e+00 : f32
    %10 = vector.broadcast %cst_10 : f32 to vector<8x128xf32>
    %11 = arith.maximumf %9, %10 : vector<8x128xf32>
    %c0_11 = arith.constant 0 : index
    %c0_12 = arith.constant 0 : index
    %12 = vector.load %arg6[%c0_11, %c0_12] : memref<128x128xf32, #tpu.memory_space<vmem>>, vector<128x128xf32>
    %cst_13 = arith.constant dense<0.000000e+00> : vector<8x128xf32>
    %13 = tpu.matmul %11, %12, %cst_13 {dimension_numbers = #tpu.dot_dimension_numbers<[1], [0], [0], [1], [0, 0, 1, 1], [], []>} : vector<8x128xf32>, vector<128x128xf32>, vector<8x128xf32> -> vector<8x128xf32>
    %c0_14 = arith.constant 0 : index
    %c0_15 = arith.constant 0 : index
    %14 = vector.load %arg7[%c0_14, %c0_15] : memref<1x128xf32, #tpu.memory_space<vmem>>, vector<1x128xf32>
    %15 = vector.broadcast %14 : vector<1x128xf32> to vector<8x128xf32>
    %16 = arith.addf %13, %15 : vector<8x128xf32>
    %cst_16 = arith.constant 0.000000e+00 : f32
    %17 = vector.broadcast %cst_16 : f32 to vector<8x128xf32>
    %18 = arith.maximumf %16, %17 : vector<8x128xf32>
    %c0_17 = arith.constant 0 : index
    %c0_18 = arith.constant 0 : index
    %19 = vector.load %arg8[%c0_17, %c0_18] : memref<1x128xf32, #tpu.memory_space<vmem>>, vector<1x128xf32>
    %20 = vector.broadcast %19 : vector<1x128xf32> to vector<8x128xf32>
    %21 = arith.mulf %18, %20 : vector<8x128xf32>
    %cst_19 = arith.constant dense<0.000000e+00> : vector<8xf32>
    %22 = vector.multi_reduction <add>, %21, %cst_19 [1] : vector<8x128xf32> to vector<8xf32>
    %23 = vector.shape_cast %22 : vector<8xf32> to vector<8x1xf32>
    %c0_20 = arith.constant 0 : index
    %c0_21 = arith.constant 0 : index
    %24 = vector.load %arg9[%c0_20, %c0_21] : memref<1x1xf32, #tpu.memory_space<vmem>>, vector<1x1xf32>
    %25 = vector.broadcast %24 : vector<1x1xf32> to vector<8x1xf32>
    %26 = arith.addf %23, %25 : vector<8x1xf32>
    %c0_22 = arith.constant 0 : index
    %c0_23 = arith.constant 0 : index
    %27 = vector.load %arg10[%c0_22, %c0_23] : memref<8x1xf32, #tpu.memory_space<vmem>>, vector<8x1xf32>
    tpu.vector_store %arg10[%c0_22, %c0_23], %26 {strides = array<i32>} : memref<8x1xf32, #tpu.memory_space<vmem>>, vector<8x1xf32>,
    return
  }
  func.func @transform_0(%arg0: i32) -> (i32, i32) {
    %c0_i32 = arith.constant 0 : i32
    %c0_i32_0 = arith.constant 0 : i32
    return %arg0, %c0_i32 : i32, i32
  }
  func.func @transform_1(%arg0: i32) -> (i32, i32) {
    %c0_i32 = arith.constant 0 : i32
    %c0_i32_0 = arith.constant 0 : i32
    return %arg0, %c0_i32 : i32, i32
  }
  func.func @transform_2(%arg0: i32) -> (i32, i32) {
    %c0_i32 = arith.constant 0 : i32
    %c0_i32_0 = arith.constant 0 : i32
    %c0_i32_1 = arith.constant 0 : i32
    return %c0_i32, %c0_i32_0 : i32, i32
  }
  func.func @transform_3(%arg0: i32) -> (i32, i32) {
    %c0_i32 = arith.constant 0 : i32
    %c0_i32_0 = arith.constant 0 : i32
    %c0_i32_1 = arith.constant 0 : i32
    return %c0_i32, %c0_i32_0 : i32, i32
  }
  func.func @transform_4(%arg0: i32) -> (i32, i32) {
    %c0_i32 = arith.constant 0 : i32
    %c0_i32_0 = arith.constant 0 : i32
    %c0_i32_1 = arith.constant 0 : i32
    return %c0_i32, %c0_i32_0 : i32, i32
  }
  func.func @transform_5(%arg0: i32) -> (i32, i32) {
    %c0_i32 = arith.constant 0 : i32
    %c0_i32_0 = arith.constant 0 : i32
    %c0_i32_1 = arith.constant 0 : i32
    return %c0_i32, %c0_i32_0 : i32, i32
  }
  func.func @transform_6(%arg0: i32) -> (i32, i32) {
    %c0_i32 = arith.constant 0 : i32
    %c0_i32_0 = arith.constant 0 : i32
    %c0_i32_1 = arith.constant 0 : i32
    return %c0_i32, %c0_i32_0 : i32, i32
  }
  func.func @transform_7(%arg0: i32) -> (i32, i32) {
    %c0_i32 = arith.constant 0 : i32
    %c0_i32_0 = arith.constant 0 : i32
    %c0_i32_1 = arith.constant 0 : i32
    return %c0_i32, %c0_i32_0 : i32, i32
  }
  func.func @transform_8(%arg0: i32) -> (i32, i32) {
    %c0_i32 = arith.constant 0 : i32
    %c0_i32_0 = arith.constant 0 : i32
    %c0_i32_1 = arith.constant 0 : i32
    return %c0_i32, %c0_i32_0 : i32, i32
  }
  func.func @transform_9(%arg0: i32) -> (i32, i32) {
    %c0_i32 = arith.constant 0 : i32
    %c0_i32_0 = arith.constant 0 : i32
    return %arg0, %c0_i32 : i32, i32
  }
}

</mosaic_0001>

<bundles_post_ra>
// kernel: tpu_custom_call.1
= control target key start
LH: loop header
LB: loop body
LE: loop exit
PB: predicated region body
PF: predicated region fallthrough
CT: control target
= control target key end

     0   :  { %s701_s0 = inlined_call_operand.hbm [shape: f32[8,16], index: 0, kind: input, shape index: {}]   ;;  %s702_s1 = inlined_call_operand.hbm [shape: f32[8,8], index: 1, kind: input, shape index: {}]   ;;  %s703_s2 = inlined_call_operand.hbm [shape: f32[16,128], index: 2, kind: input, shape index: {}]   ;;  %s704_s3 = inlined_call_operand.vmem [shape: f32[8,128], index: 3, kind: input, shape index: {}]   ;;  %s705_s4 = inlined_call_operand.vmem [shape: f32[1,128], index: 4, kind: input, shape index: {}]   ;;  %s706_s5 = inlined_call_operand.hbm [shape: f32[128,128], index: 5, kind: input, shape index: {}]   ;;  %s707_s6 = inlined_call_operand.vmem [shape: f32[1,128], index: 6, kind: input, shape index: {}]   ;;  %s708_s7 = inlined_call_operand.vmem [shape: f32[1,128], index: 7, kind: input, shape index: {}]   ;;  %s709_s8 = inlined_call_operand.<no memory space> [shape: f32[1,1], index: 8, kind: input, shape index: {}]   ;;  %s710_s9 = inlined_call_operand.vmem [shape: f32[8,1], index: 9, kind: output, shape index: {}]  }
   0x1   :  { %v14_v0 = vstv %s709_s8 }
   0x2   :  { %15 = vst [vmem:[#allocation2] sm:$0x1] %v14_v0 }
   0x3   :  { %16 = vsyncpa [#allocation4], 0 }
   0x4   :  { %17 = vsyncpa [#allocation6], 0 }
   0x5   :  { %18 = vsyncpa [#allocation9], 0  ;;  %s573_s11 = smov [#allocation5]   ;;  %s574_s13 = smov [#allocation3]  }
   0x6   :  { %s35_s12 = sshll.u32 %s573_s11, 4  ;;  %s25_s14 = sshll.u32 %s574_s13, 4  ;;  %s36_s12 = int_to_ptr.vmem [resolvable:$true] %s35_s12  ;;  %s26_s14 = int_to_ptr.vmem [resolvable:$true] %s25_s14 }
   0x7   :  { %s479_s17 = scalar_lea.hbm %s702_s1, 128 }
   0x8   :  { %p480_p0 = scmp.ne.s32.totalorder %s702_s1, %s479_s17  ;;  %p483_p1 = scmp.lt.u32.totalorder %s479_s17, %s702_s1 }
   0xa   :  { %p485_p2 = pnand %p483_p1, %p480_p0 }
   0xc   :  { %488 = shalt.err (!%p485_p2)
}
   0xd   :  { %s489_s21 = scalar_lea.vmem %s36_s12, 128  ;;  %p494_p4 = scmp.lt.s32.totalorder %s36_s12, %s36_s12 }
   0xe   :  { %p490_p3 = scmp.ne.s32.totalorder %s36_s12, %s489_s21  ;;  %p495_p5 = scmp.lt.s32.totalorder %s489_s21, %s489_s21 }
  0x10   :  { %p496_p6 = por %p495_p5, %p494_p4 }
  0x12   :  { %p497_p7 = pnand %p496_p6, %p490_p3 }
  0x14   :  { %500 = shalt.err (!%p497_p7)
}
  0x15   :  { %38 = dma.hbm_to_vmem [thread:$0]  %s702_s1, 128, %s36_s12, [#allocation6]  }
  0x16   :  { %s501_s26 = scalar_lea.hbm %s701_s0, 128 }
  0x17   :  { %p502_p8 = scmp.ne.s32.totalorder %s701_s0, %s501_s26  ;;  %p505_p9 = scmp.lt.u32.totalorder %s501_s26, %s701_s0 }
  0x19   :  { %p507_p10 = pnand %p505_p9, %p502_p8 }
  0x1b   :  { %510 = shalt.err (!%p507_p10)
}
  0x1c   :  { %s511_s10 = scalar_lea.vmem %s26_s14, 128  ;;  %p516_p12 = scmp.lt.s32.totalorder %s26_s14, %s26_s14 }
  0x1d   :  { %p512_p11 = scmp.ne.s32.totalorder %s26_s14, %s511_s10  ;;  %p517_p13 = scmp.lt.s32.totalorder %s511_s10, %s511_s10 }
  0x1f   :  { %p518_p0 = por %p517_p13, %p516_p12 }
  0x21   :  { %p519_p1 = pnand %p518_p0, %p512_p11 }
  0x23   :  { %522 = shalt.err (!%p519_p1)
}
  0x24   :  { %28 = dma.hbm_to_vmem [thread:$0]  %s701_s0, 128, %s26_s14, [#allocation4]  }
  0x25   :  { %s575_s12 = smov [#allocation7]   ;;  %s523_s17 = scalar_lea.hbm %s703_s2, 256 }
  0x26   :  { %s44_s13 = sshll.u32 %s575_s12, 4  ;;  %p524_p2 = scmp.ne.s32.totalorder %s703_s2, %s523_s17  ;;  %s45_s13 = int_to_ptr.vmem [resolvable:$true] %s44_s13 }
  0x27   :  { %p527_p3 = scmp.lt.u32.totalorder %s523_s17, %s703_s2 }
  0x29   :  { %p529_p4 = pnand %p527_p3, %p524_p2 }
  0x2b   :  { %532 = shalt.err (!%p529_p4)
}
  0x2c   :  { %s533_s21 = scalar_lea.vmem %s45_s13, 256  ;;  %p538_p6 = scmp.lt.s32.totalorder %s45_s13, %s45_s13 }
  0x2d   :  { %p534_p5 = scmp.ne.s32.totalorder %s45_s13, %s533_s21  ;;  %p539_p7 = scmp.lt.s32.totalorder %s533_s21, %s533_s21 }
  0x2f   :  { %p540_p8 = por %p539_p7, %p538_p6 }
  0x31   :  { %p541_p9 = pnand %p540_p8, %p534_p5 }
  0x33   :  { %544 = shalt.err (!%p541_p9)
}
  0x34   :  { %s576_s0 = smov 128   ;;  %s577_s14 = smov 8  }
  0x35   :  { %50 = dma.hbm_to_vmem [thread:$0]  %s703_s2, 256, %s45_s13, [#allocation6], %s576_s0, %s576_s0, %s577_s14  }
  0x36   :  { %s578_s24 = smov [#allocation8]   ;;  %s545_s28 = scalar_lea.hbm %s706_s5, 2048 }
  0x37   :  { %s60_s25 = sshll.u32 %s578_s24, 4  ;;  %p546_p10 = scmp.ne.s32.totalorder %s706_s5, %s545_s28  ;;  %s61_s25 = int_to_ptr.vmem [resolvable:$true] %s60_s25 }
  0x38   :  { %p549_p11 = scmp.lt.u32.totalorder %s545_s28, %s706_s5 }
  0x3a   :  { %p551_p12 = pnand %p549_p11, %p546_p10 }
  0x3c   :  { %554 = shalt.err (!%p551_p12)
}
  0x3d   :  { %s555_s11 = scalar_lea.vmem %s61_s25, 2048  ;;  %p560_p0 = scmp.lt.s32.totalorder %s61_s25, %s61_s25 }
  0x3e   :  { %p556_p13 = scmp.ne.s32.totalorder %s61_s25, %s555_s11  ;;  %p561_p1 = scmp.lt.s32.totalorder %s555_s11, %s555_s11 }
  0x40   :  { %p562_p2 = por %p561_p1, %p560_p0 }
  0x42   :  { %p563_p3 = pnand %p562_p2, %p556_p13 }
  0x44   :  { %566 = shalt.err (!%p563_p3)
}
  0x45   :  { %66 = dma.hbm_to_vmem [thread:$0]  %s706_s5, 2048, %s61_s25, [#allocation9], %s576_s0, %s576_s0, %s577_s14  }
  0x46   :  { %567 = dma.done.wait [#allocation4], 128  }
  0x47   :  { %568 = vsyncadd [#allocation4], 4294967168 }
  0x48   :  { %569 = dma.done.wait [#allocation6], 384  }
  0x49   :  { %570 = vsyncadd [#allocation6], 4294966912 }
  0x4a   :  { %571 = dma.done.wait [#allocation9], 2048  }
  0x4b   :  { %572 = vsyncadd [#allocation9], 4294965248  ;;  %v579_v1 = vmov 0.0   ;;  %vm580_vm0 = vmmov 0   ;;  %v581_v2 = vmov 0.0|0.0   ;;  %vm90_vm1 = vcmask 64512  }
  0x4c   :  { %396 = vmatprep.subr.mxu1 %v579_v1  ;;  %398 = vmatprep.mubr.msk.f32.mxu1 %vm580_vm0, %v579_v1  ;;  %v89_v3 = vld [vmem:[%s704_s3] sm:$0xff]  ;;  %v88_v4 = vld [vmem:[#allocation5] sm:$0xff]  ;;  %v86_v5 = vld [vmem:[#allocation7] sm:$0xff]  ;;  %vm164_vm2 = vcmask 130048   ;;  %vm359_vm3 = vcmask 7168  }
  0x4d   :  { %446 = vmatprep.subr.bf16.mxu0 %v581_v2  ;;  %440 = vmatprep.mubr.msk.f32.mxu0 %vm580_vm0, %v579_v1  ;;  %v87_v6 = vld [vmem:[#allocation7 + $0x8] sm:$0xff]  ;;  %v247_v7 = vld [vmem:[#allocation8] sm:$0xff]  ;;  %v248_v9 = vld [vmem:[#allocation8 + $0x8] sm:$0xff] }
  0x4e   :  { %397 = vmatpush3.msra.mxu1 %v89_v3  ;;  %v444_v8 = vpack.c.bf16 %v87_v6, %v86_v5  ;;  %v249_v10 = vld [vmem:[#allocation8 + $0x10] sm:$0xff]  ;;  %v250_v11 = vld [vmem:[#allocation8 + $0x18] sm:$0xff]  ;;  %v447_v12 = vpack.c.bf16 %v248_v9, %v247_v7  ;;  %v85_v13 = vld [vmem:[#allocation3] sm:$0xff] }
  0x4f   :  { %399 = vmatmul.mubr.msk.f32.vlgmr.msra.gmra.mrb[0].mxu1 %vm90_vm1, %v88_v4  ;;  %443 = vmatprep.subr.bf16.mxu1 %v581_v2  ;;  %v450_v14 = vpack.c.bf16 %v250_v11, %v249_v10  ;;  %v251_v15 = vld [vmem:[#allocation8 + $0x20] sm:$0xff]  ;;  %v252_v16 = vld [vmem:[#allocation8 + $0x28] sm:$0xff]  ;;  %v253_v18 = vld [vmem:[#allocation8 + $0x30] sm:$0xff] }
  0x50   :  { %405 = vmatprep.mubr.msk.f32.mxu1 %vm580_vm0, %v579_v1  ;;  %445 = vmatpush3.bf16.msra.mxu1 %v444_v8  ;;  %v453_v17 = vpack.c.bf16 %v252_v16, %v251_v15  ;;  %v254_v19 = vld [vmem:[#allocation8 + $0x38] sm:$0xff]  ;;  %v255_v21 = vld [vmem:[#allocation8 + $0x40] sm:$0xff]  ;;  %v256_v22 = vld [vmem:[#allocation8 + $0x48] sm:$0xff] }
  0x51   :  { %448 = vmatpush3.bf16.msra.mxu0 %v447_v12  ;;  %v456_v20 = vpack.c.bf16 %v254_v19, %v253_v18  ;;  %v459_v23 = vpack.c.bf16 %v256_v22, %v255_v21  ;;  %v257_v24 = vld [vmem:[#allocation8 + $0x50] sm:$0xff]  ;;  %v258_v25 = vld [vmem:[#allocation8 + $0x58] sm:$0xff]  ;;  %v259_v27 = vld [vmem:[#allocation8 + $0x60] sm:$0xff] }
  0x52   :  { %449 = vmatprep.subr.bf16.mxu0 %v581_v2  ;;  %v462_v26 = vpack.c.bf16 %v258_v25, %v257_v24  ;;  %v260_v28 = vld [vmem:[#allocation8 + $0x68] sm:$0xff]  ;;  %v261_v30 = vld [vmem:[#allocation8 + $0x70] sm:$0xff]  ;;  %v262_v31 = vld [vmem:[#allocation8 + $0x78] sm:$0xff] }
  0x53   :  { %406 = vmatmul.mubr.msk.f32.vlgmr.msra.gmra.mrb[2].mxu1 %vm164_vm2, %v85_v13  ;;  %v465_v29 = vpack.c.bf16 %v260_v28, %v259_v27  ;;  %v468_v32 = vpack.c.bf16 %v262_v31, %v261_v30  ;;  %v370_v36 = vld [vmem:[%s705_s4] ss:$0 sm:$0xff] }
  0x54   :  { %v371_v41 = vld [vmem:[%s707_s6] ss:$0 sm:$0xff] }
  0x55   :  { %451 = vmatpush3.bf16.msra.mxu0 %v450_v14  ;;  %v372_v45 = vld [vmem:[%s708_s7] ss:$0 sm:$0xff] }
  0x56   :  { %452 = vmatprep.subr.bf16.mxu0 %v581_v2  ;;  %v373_v48 = vld [vmem:[#allocation2] ss:$0 sm:$0xff] }
  0x59   :  { %454 = vmatpush3.bf16.msra.mxu0 %v453_v17 }
  0x5a   :  { %455 = vmatprep.subr.bf16.mxu0 %v581_v2 }
  0x5d   :  { %457 = vmatpush3.bf16.msra.mxu0 %v456_v20 }
  0x5e   :  { %458 = vmatprep.subr.bf16.mxu0 %v581_v2 }
  0x61   :  { %460 = vmatpush3.bf16.msra.mxu0 %v459_v23 }
  0x62   :  { %461 = vmatprep.subr.bf16.mxu0 %v581_v2 }
  0x65   :  { %463 = vmatpush3.bf16.msra.mxu0 %v462_v26 }
  0x66   :  { %464 = vmatprep.subr.bf16.mxu0 %v581_v2 }
  0x69   :  { %466 = vmatpush3.bf16.msra.mxu0 %v465_v29 }
  0x6a   :  { %467 = vmatprep.subr.bf16.mxu0 %v581_v2 }
  0x6d   :  { %469 = vmatpush3.bf16.msra.mxu0 %v468_v32 }
 0x122   :  { %v160_v33 = vpop.f32.mrb[0].mxu1 }
 0x123   :  { %v400_v34 = vpop.f32.mrb[1].mxu1 }
 0x126   :  { %v234_v35 = vpop.f32.mrb[2].mxu1 }
 0x127   :  { %v235_v37 = vadd.f32 %v234_v35, %v160_v33  ;;  %v407_v38 = vpop.f32.mrb[3].mxu1 }
 0x129   :  { %v245_v39 = vadd.f32 %v370_v36, %v235_v37 }
 0x12b   :  { %v246_v40 = vmax.f32 %v245_v39, 0.0 }
 0x12d   :  { %441 = vmatmul.mubr.f32.vlgmr.msra.gmra.mrb[0].mxu0 %v246_v40 }
 0x200   :  { %v336_v42 = vpop.f32.mrb[0].mxu0 }
 0x201   :  { %v337_v43 = vadd.f32 %v371_v41, %v336_v42  ;;  %v442_v44 = vpop.f32.mrb[1].mxu0 }
 0x203   :  { %v340_v46 = vmax.f32 %v337_v43, 0.0 }
 0x205   :  { %v348_v47 = vmul.f32 %v372_v45, %v340_v46 }
 0x207   :  { %349 = vadd.xlane.f32.xlu0 %v348_v47 }
 0x294   :  { %v350_v49 = vpop.xlane.xlu0 %349 }
 0x295   :  { %v358_v50 = vadd.f32 %v373_v48, %v350_v49 }
 0x297   :  { %360 = vst.msk [vmem:[%s710_s9] sm:$0xff] %vm359_vm3, %v358_v50 }
 0x298   :  { %365 = vsyncpa [#allocation4], 1 }
 0x299   :  { %366 = vsyncpa [#allocation6], 1 }
 0x29a   :  { %367 = vsyncpa [#allocation9], 1 }

</bundles_post_ra>
